<compile_context>
chip_gen: v7x
topology: tpu7x:2x2x1
jax: 0.10.0
libtpu: 0.0.40
codegen_flags: <defaults>
</compile_context>

<pallas_src>
import jax
import jax.numpy as jnp
from jax.experimental import pallas as pl
from jax.experimental.pallas import tpu as pltpu

IN_CH = 512    # target_in_size
HID = 256      # target_fc1_size
EPS = 1e-5     # BatchNorm1d default eps


def regression_fc_kernel(x_ref, w1_ref, b1_ref, alpha_ref, w2_ref, b2_ref, o_ref):
    # q = l1(x): cast x to bf16 on the VPU right before the MXU op (no wrapper HBM pass),
    # f32 accumulation on the MXU.
    h = jnp.dot(x_ref[...].astype(jnp.bfloat16), w1_ref[...],
                preferred_element_type=jnp.float32)
    h = h + b1_ref[...]                                          # (TB, HID)

    # q = PReLU(q)  (single learnable slope, scalar in SMEM)
    a = alpha_ref[0, 0]
    h = jnp.where(h >= 0.0, h, a * h)

    # q = Dropout(0.5)(q) -> identity in eval mode
    # TODO(synk): training-mode dropout masking and batch-stat BatchNorm are not
    #             implemented; this kernel reproduces eval/inference semantics.

    # q = bn1(q); q = l2(q): BatchNorm is folded into w2/b2 in the wrapper, and the
    # 256->1 projection runs as a VPU multiply + lane reduce (XLU) instead of an
    # N=1 MXU matmul.
    o_ref[...] = jnp.sum(h * w2_ref[...], axis=-1, keepdims=True) + b2_ref[0, 0]


def regression_fc_net2(x, params, *, block_b=2048):
    """x: (B, IN_CH) float -> (B,) float32 (matches torch .squeeze() for B > 1)."""
    B = x.shape[0]
    itemsize = jnp.dtype(x.dtype).itemsize

    # --- batch tiling -----------------------------------------------------------
    # Round B up to 8 sublanes, then pick the number of grid steps first and derive
    # the tile from it, so padding is at most (n_steps * 8) rows (never a full tile).
    # Force >= 2 steps when there is enough work so the "parallel" batch axis can be
    # sharded across both v7x TensorCores (no-op on single-TC v5e/v6e).
    b8 = ((B + 7) // 8) * 8
    n_steps = max(pl.cdiv(b8, block_b), 2 if b8 >= 16 else 1)
    tb = ((pl.cdiv(b8, n_steps) + 7) // 8) * 8
    b_pad = n_steps * tb
    if b_pad != B:
        x = jnp.pad(x, ((0, b_pad - B), (0, 0)))

    # --- parameters (wrapper-side, one-time, tiny) --------------------------------
    w1_bf = params["w1"].astype(jnp.bfloat16)                    # (IN_CH, HID)
    b1 = params["b1"].astype(jnp.float32)                        # (1, HID)
    alpha = params["alpha"].astype(jnp.float32)                  # (1, 1) -> SMEM

    # Fold BatchNorm1d (running stats + affine) into the second linear, in f32:
    #   BN(h) = h*s + c,  s = gamma*rsqrt(var+eps),  c = beta - mean*s
    #   l2(BN(h)) = h @ (w2 * s[:,None]) + (c @ w2 + b2)
    s = params["gamma"] * jax.lax.rsqrt(params["var"] + EPS)     # (1, HID)
    w2_row = (params["w2"][:, 0] * s[0]).reshape(1, HID).astype(jnp.float32)
    b2_eff = (params["b2"][0, 0]
              + jnp.dot((params["beta"] - params["mean"] * s)[0], params["w2"][:, 0]))
    b2_eff = b2_eff.reshape(1, 1).astype(jnp.float32)

    # --- VMEM budget / compiler params --------------------------------------------
    vmem_need = (2 * tb * IN_CH * itemsize       # x tile, double-buffered
                 + IN_CH * HID * 2               # w1 (bf16), single-buffered
                 + 4 * HID * 4                   # b1 + folded w2 row
                 + 2 * tb * 4                    # out tile, double-buffered
                 + tb * HID * 4)                 # h intermediate
    vmem_limit = None
    if vmem_need > 14 * 1024 * 1024:             # only raise above the scoped default
        vmem_limit = min(int(vmem_need * 3 // 2), 56 * 1024 * 1024)

    cost = pl.CostEstimate(
        flops=2 * b_pad * IN_CH * HID + 4 * b_pad * HID,
        transcendentals=0,
        bytes_accessed=(b_pad * IN_CH * itemsize   # x in its boundary dtype
                        + IN_CH * HID * 2          # w1 (bf16)
                        + 2 * HID * 4              # b1 + folded w2 row
                        + b_pad * 4),              # output
    )

    smem_spec = lambda: pl.BlockSpec(memory_space=pltpu.MemorySpace.SMEM)
    resident = lambda shape: pl.BlockSpec(shape, lambda i: (0, 0),
                                          pipeline_mode=pl.Buffered(1))

    out = pl.pallas_call(
        regression_fc_kernel,
        out_shape=jax.ShapeDtypeStruct((b_pad, 1), jnp.float32),
        grid=(n_steps,),
        in_specs=[
            pl.BlockSpec((tb, IN_CH), lambda i: (i, 0)),   # x tile (pipelined per step)
            resident((IN_CH, HID)),                        # w1 (resident, single-buffered)
            resident((1, HID)),                            # b1
            smem_spec(),                                   # PReLU slope scalar
            resident((1, HID)),                            # BN-folded w2 row
            smem_spec(),                                   # BN-folded bias scalar
        ],
        out_specs=pl.BlockSpec((tb, 1), lambda i: (i, 0)),
        compiler_params=pltpu.CompilerParams(
            dimension_semantics=("parallel",),             # megacore sharding on v7x
            vmem_limit_bytes=vmem_limit),
        cost_estimate=cost,
    )(x, w1_bf, b1, alpha, w2_row, b2_eff)

    return out[:B, 0]


def init_params(key):
    """Deterministic parameter init mirroring the PyTorch module's __init__ shapes."""
    k1, k2, k3, k4 = jax.random.split(key, 4)
    lim1 = 1.0 / jnp.sqrt(jnp.float32(IN_CH))
    lim2 = 1.0 / jnp.sqrt(jnp.float32(HID))
    w1 = jax.random.uniform(k1, (IN_CH, HID), jnp.float32, -lim1, lim1)  # l1.weight.T
    b1 = jax.random.uniform(k2, (1, HID), jnp.float32, -lim1, lim1)      # l1.bias
    w2 = jax.random.uniform(k3, (HID, 1), jnp.float32, -lim2, lim2)      # l2.weight.T
    b2 = jax.random.uniform(k4, (1, 1), jnp.float32, -lim2, lim2)        # l2.bias
    return {
        "w1": w1, "b1": b1,
        "alpha": jnp.full((1, 1), 0.25, jnp.float32),   # PReLU default
        "gamma": jnp.ones((1, HID), jnp.float32),       # bn1.weight
        "beta": jnp.zeros((1, HID), jnp.float32),       # bn1.bias
        "mean": jnp.zeros((1, HID), jnp.float32),       # bn1.running_mean
        "var": jnp.ones((1, HID), jnp.float32),         # bn1.running_var
        "w2": w2, "b2": b2,
    }


def reference(x, params):
    """Pure-JAX f32 eval-mode reference of the PyTorch forward."""
    h = x @ params["w1"] + params["b1"]
    a = params["alpha"][0, 0]
    h = jnp.where(h >= 0.0, h, a * h)
    h = ((h - params["mean"]) * jax.lax.rsqrt(params["var"] + EPS)
         * params["gamma"] + params["beta"])
    return (h @ params["w2"] + params["b2"])[:, 0]


if __name__ == "__main__":
    key = jax.random.PRNGKey(0)
    kx, kp = jax.random.split(key)
    B = 19   # non-multiple of 8: exercises the 2-step grid and the small padded tail
    x = jax.random.normal(kx, (B, IN_CH), jnp.float32)
    params = init_params(kp)

    out = jax.block_until_ready(regression_fc_net2(x, params))
    ref = reference(x, params)

    assert out.shape == (B,), out.shape
    assert bool(jnp.all(jnp.isfinite(out)))
    assert bool(jnp.allclose(out, ref, rtol=3e-2, atol=3e-2)), (out, ref)
    print("KERNEL_OK")
</pallas_src>

<mosaic_0001>
module attributes {stable_mosaic.version = 11 : i64} {
  func.func @regression_fc_kernel(%arg0: i32, %arg1: memref<16x512xf32, #tpu.memory_space<vmem>>, %arg2: memref<512x256xbf16, #tpu.memory_space<vmem>>, %arg3: memref<1x256xf32, #tpu.memory_space<vmem>>, %arg4: memref<1x1xf32, #tpu.memory_space<smem>>, %arg5: memref<1x256xf32, #tpu.memory_space<vmem>>, %arg6: memref<1x1xf32, #tpu.memory_space<smem>>, %arg7: memref<16x1xf32, #tpu.memory_space<vmem>>) attributes {dimension_semantics = [#tpu.dimension_semantics<parallel>], iteration_bounds = array<i64: 2>, scalar_prefetch = 0 : i64, scratch_operands = 0 : i64, tpu.core_type = #tpu.core_type<tc>, window_params = [{transform_indices = @transform_0, window_bounds = array<i64: 16, 512>}, {pipeline_mode = #tpu.pipeline_mode<synchronous>, transform_indices = @transform_1, window_bounds = array<i64: 512, 256>}, {pipeline_mode = #tpu.pipeline_mode<synchronous>, transform_indices = @transform_2, window_bounds = array<i64: 1, 256>}, {transform_indices = @transform_3, window_bounds = array<i64: 1, 1>}, {pipeline_mode = #tpu.pipeline_mode<synchronous>, transform_indices = @transform_4, window_bounds = array<i64: 1, 256>}, {transform_indices = @transform_5, window_bounds = array<i64: 1, 1>}, {transform_indices = @transform_6, window_bounds = array<i64: 16, 1>}]} {
    %c0 = arith.constant 0 : index
    %c0_0 = arith.constant 0 : index
    %0 = vector.load %arg1[%c0, %c0_0] : memref<16x512xf32, #tpu.memory_space<vmem>>, vector<16x512xf32>
    %1 = arith.truncf %0 : vector<16x512xf32> to vector<16x512xbf16>
    %c0_1 = arith.constant 0 : index
    %c0_2 = arith.constant 0 : index
    %2 = vector.load %arg2[%c0_1, %c0_2] : memref<512x256xbf16, #tpu.memory_space<vmem>>, vector<512x256xbf16>
    %cst = arith.constant dense<0.000000e+00> : vector<16x256xf32>
    %3 = tpu.matmul %1, %2, %cst {dimension_numbers = #tpu.dot_dimension_numbers<[1], [0], [0], [1], [0, 0, 1, 1], [], []>} : vector<16x512xbf16>, vector<512x256xbf16>, vector<16x256xf32> -> vector<16x256xf32>
    %c0_3 = arith.constant 0 : index
    %c0_4 = arith.constant 0 : index
    %4 = vector.load %arg3[%c0_3, %c0_4] : memref<1x256xf32, #tpu.memory_space<vmem>>, vector<1x256xf32>
    %5 = vector.broadcast %4 : vector<1x256xf32> to vector<16x256xf32>
    %6 = arith.addf %3, %5 : vector<16x256xf32>
    %c0_5 = arith.constant 0 : index
    %c0_6 = arith.constant 0 : index
    %7 = memref.load %arg4[%c0_5, %c0_6] : memref<1x1xf32, #tpu.memory_space<smem>>
    %cst_7 = arith.constant 0.000000e+00 : f32
    %8 = vector.broadcast %cst_7 : f32 to vector<16x256xf32>
    %9 = arith.cmpf oge, %6, %8 : vector<16x256xf32>
    %10 = vector.broadcast %7 : f32 to vector<16x256xf32>
    %11 = arith.mulf %10, %6 : vector<16x256xf32>
    %12 = arith.select %9, %6, %11 : vector<16x256xi1>, vector<16x256xf32>
    %c0_8 = arith.constant 0 : index
    %c0_9 = arith.constant 0 : index
    %13 = vector.load %arg5[%c0_8, %c0_9] : memref<1x256xf32, #tpu.memory_space<vmem>>, vector<1x256xf32>
    %14 = vector.broadcast %13 : vector<1x256xf32> to vector<16x256xf32>
    %15 = arith.mulf %12, %14 : vector<16x256xf32>
    %cst_10 = arith.constant dense<0.000000e+00> : vector<16xf32>
    %16 = vector.multi_reduction <add>, %15, %cst_10 [1] : vector<16x256xf32> to vector<16xf32>
    %17 = vector.shape_cast %16 : vector<16xf32> to vector<16x1xf32>
    %c0_11 = arith.constant 0 : index
    %c0_12 = arith.constant 0 : index
    %18 = memref.load %arg6[%c0_11, %c0_12] : memref<1x1xf32, #tpu.memory_space<smem>>
    %19 = vector.broadcast %18 : f32 to vector<16x1xf32>
    %20 = arith.addf %17, %19 : vector<16x1xf32>
    %c0_13 = arith.constant 0 : index
    %c0_14 = arith.constant 0 : index
    %21 = vector.load %arg7[%c0_13, %c0_14] : memref<16x1xf32, #tpu.memory_space<vmem>>, vector<16x1xf32>
    tpu.vector_store %arg7[%c0_13, %c0_14], %20 {strides = array<i32>} : memref<16x1xf32, #tpu.memory_space<vmem>>, vector<16x1xf32>,
    return
  }
  func.func @transform_0(%arg0: i32) -> (i32, i32) {
    %c0_i32 = arith.constant 0 : i32
    %c0_i32_0 = arith.constant 0 : i32
    return %arg0, %c0_i32 : i32, i32
  }
  func.func @transform_1(%arg0: i32) -> (i32, i32) {
    %c0_i32 = arith.constant 0 : i32
    %c0_i32_0 = arith.constant 0 : i32
    %c0_i32_1 = arith.constant 0 : i32
    return %c0_i32, %c0_i32_0 : i32, i32
  }
  func.func @transform_2(%arg0: i32) -> (i32, i32) {
    %c0_i32 = arith.constant 0 : i32
    %c0_i32_0 = arith.constant 0 : i32
    %c0_i32_1 = arith.constant 0 : i32
    return %c0_i32, %c0_i32_0 : i32, i32
  }
  func.func @transform_3(%arg0: i32) -> (i32, i32) {
    %c0_i32 = arith.constant 0 : i32
    %c0_i32_0 = arith.constant 0 : i32
    %c0_i32_1 = arith.constant 0 : i32
    return %c0_i32, %c0_i32_0 : i32, i32
  }
  func.func @transform_4(%arg0: i32) -> (i32, i32) {
    %c0_i32 = arith.constant 0 : i32
    %c0_i32_0 = arith.constant 0 : i32
    %c0_i32_1 = arith.constant 0 : i32
    return %c0_i32, %c0_i32_0 : i32, i32
  }
  func.func @transform_5(%arg0: i32) -> (i32, i32) {
    %c0_i32 = arith.constant 0 : i32
    %c0_i32_0 = arith.constant 0 : i32
    %c0_i32_1 = arith.constant 0 : i32
    return %c0_i32, %c0_i32_0 : i32, i32
  }
  func.func @transform_6(%arg0: i32) -> (i32, i32) {
    %c0_i32 = arith.constant 0 : i32
    %c0_i32_0 = arith.constant 0 : i32
    return %arg0, %c0_i32 : i32, i32
  }
}

</mosaic_0001>

<bundles_post_ra>
// kernel: tpu_custom_call.1
= control target key start
LH: loop header
LB: loop body
LE: loop exit
PB: predicated region body
PF: predicated region fallthrough
CT: control target
= control target key end

     0   :  { %s1452_s0 = inlined_call_operand.hbm [shape: f32[32,512], index: 0, kind: input, shape index: {}]   ;;  %s1453_s1 = inlined_call_operand.hbm [shape: bf16[512,256], index: 1, kind: input, shape index: {}]   ;;  %s1454_s2 = inlined_call_operand.vmem [shape: f32[1,256], index: 2, kind: input, shape index: {}]   ;;  %s1455_s3 = inlined_call_operand.<no memory space> [shape: f32[1,1], index: 3, kind: input, shape index: {}]   ;;  %s1456_s4 = inlined_call_operand.vmem [shape: f32[1,256], index: 4, kind: input, shape index: {}]   ;;  %s1457_s5 = inlined_call_operand.<no memory space> [shape: f32[1,1], index: 5, kind: input, shape index: {}]   ;;  %s1458_s6 = inlined_call_operand.vmem [shape: f32[32,1], index: 6, kind: output, shape index: {}]  }
   0x1   :  { %11 = sst [smem:[#allocation2]] %s1455_s3 }
   0x2   :  { %12 = sst [smem:[#allocation3]] %s1457_s5 }
   0x3   :  { %13 = vsyncpa [#allocation5], 0 }
   0x4   :  { %15 = vsyncpa [#allocation5 + $0x1], 0 }
   0x5   :  { %16 = vsyncpa [#allocation7], 0  ;;  %s1291_s25 = smov 0   ;;  %s1293_s26 = smov 0  }
   0x6   :  { %s1295_s27 = smov 0   ;;  %s1297_s28 = smov 0  }
   0x7 LB: > { %s906_s3 = sadd.s32 4294967295, %s1242_s28   ;;  %p42_p0 = scmp.ne.s32.totalorder %s1234_s26, %s1230_s25  ;;  %s1242_s28 = sphi %s1297_s28, %s1475_s28   ;;  %s1238_s27 = sphi %s1295_s27, %s1474_s27   ;;  %s1234_s26 = sphi %s1293_s26, %s1473_s26   ;;  %s1230_s25 = sphi %s1291_s25, %s1472_s25  }
   0x8   : > { %p1313_p1 = scmp.eq.s32.totalorder %s906_s3, 0  ;;  %p908_p2 = scmp.ge.s32.totalorder %s1242_s28, 1 }
   0x9   : > { %p184_p3 = scmp.lt.s32.totalorder %s1242_s28, 3  ;;  %s1244_s7 = smov [#allocation6]  }
   0xa   : > { %s1463_s5 = scalar_select %p1313_p1, 1, 0 }
   0xb   : > { %p1321_p4 = por %p1313_p1, %p42_p0  ;;  %p1325_p5 = pnand %p908_p2, %p184_p3 }
   0xc   : > { %s196_s8 = sshll.u32 %s1244_s7, 4  ;;  %s1338_s10 = sadd.s32 1, %s1242_s28   ;;  %s197_s8 = int_to_ptr.vmem [resolvable:$true] %s196_s8 }
   0xd   : > { %s1464_s29 = scalar_select %p1321_p4, 1, 0 }
   0xe   : > { %s1465_s30 = scalar_select %p1325_p5, 1, 0 }
   0xf   : > { %p1002_p6 = pneg %p1325_p5  ;;  %s29_s11 = sadd.s32 1, %s1238_s27 }
  0x10   : > { %s26_s12 = ssub.s32 %s1242_s28, %s1338_s10  ;;  %s1146_s15 = scalar_lea.hbm %s1453_s1, 8192 }
  0x11   : > { %p1333_p7 = pnand %p1002_p6, %p1313_p1  ;;  %p1147_p8 = scmp.ne.s32.totalorder %s1453_s1, %s1146_s15 }
  0x12   : > { %p1153_p12 = scmp.lt.u32.totalorder %s1146_s15, %s1453_s1 }
  0x13   : > { %p1148_p9 = pneg %p1333_p7 }
  0x15   : > { %p1149_p10 = pnand %p1148_p9, %p1147_p8 }
  0x17   : > { %p1150_p11 = pneg %p1149_p10 }
  0x19   : > { %p1155_p13 = pnand %p1153_p12, %p1150_p11 }
  0x1b   : > { %1158 = shalt.err (!%p1155_p13)
}
  0x1c   : > { %s1159_s20 = scalar_lea.vmem %s197_s8, 8192  ;;  %p1167_p6 = scmp.lt.s32.totalorder %s197_s8, %s197_s8 }
  0x1d   : > { %p1160_p0 = scmp.ne.s32.totalorder %s197_s8, %s1159_s20  ;;  %p1168_p1 = scmp.lt.s32.totalorder %s1159_s20, %s1159_s20 }
  0x1f   : > { %p1162_p2 = pnand %p1160_p0, %p1148_p9  ;;  %p1169_p4 = por %p1168_p1, %p1167_p6 }
  0x21   : > { %p1163_p3 = pneg %p1162_p2 }
  0x23   : > { %p1170_p5 = pnand %p1169_p4, %p1163_p3 }
  0x25   : > { %1173 = shalt.err (!%p1170_p5)
}
  0x26   : > { %s1245_s21 = smov 128   ;;  %s1246_s22 = smov 8  }
  0x27   : > { %1005 = dma.hbm_to_vmem [thread:$0]  (!%p1333_p7), %s1453_s1, 8192, %s197_s8, [#allocation7], %s1245_s21, %s1245_s21, %s1246_s22  }
  0x28   : > { %p27_p8 = scmp.eq.s32.totalorder %s26_s12, 0  ;;  %p36_p9 = scmp.ne.s32.totalorder %s1238_s27, %s1234_s26 }
  0x29   : > { %p37_p1 = scmp.eq.s32.totalorder %s1242_s28, 0  ;;  %p1011_p4 = scmp.lt.s32.totalorder %s1242_s28, 2 }
  0x2a   : > { %s1364_s25 = scalar_select %p27_p8, %s1238_s27, %s29_s11  }
  0x2b   : > { %p38_p5 = por %p37_p1, %p36_p9  ;;  %s222_s7 = sand.u32 1, %s1238_s27  }
  0x2c   : > { %s911_s13 = sshll.u32 %s222_s7, 6  ;;  %s987_s14 = sshll.u32 %s1242_s28, 10 }
  0x2d   : > { %s1371_s17 = scalar_lea.hbm %s1452_s0, %s987_s14  ;;  %s226_s8 = scalar_lea.vmem [#allocation4], %s911_s13 }
  0x2e   : > { %s234_s9 = sshll.u32 %s226_s8, 4  ;;  %p1375_p7 = pnand %p1011_p4, %p38_p5  ;;  %s1373_s9 = int_to_ptr.vmem [resolvable:$true] %s234_s9 }
  0x2f   : > { %s1379_s12 = scalar_lea.sflag [#allocation5], %s222_s7  ;;  %s1174_s18 = scalar_lea.hbm %s1371_s17, 1024 }
  0x30   : > { %p1175_p10 = scmp.ne.s32.totalorder %s1371_s17, %s1174_s18  ;;  %p1176_p11 = pneg %p1375_p7 }
  0x31   : > { %s1179_s21 = scalar_lea.hbm %s1452_s0, 2048  ;;  %p1180_p0 = scmp.lt.u32.totalorder %s1371_s17, %s1452_s0 }
  0x32   : > { %p1177_p12 = pnand %p1176_p11, %p1175_p10  ;;  %p1181_p2 = scmp.lt.u32.totalorder %s1179_s21, %s1174_s18 }
  0x33   : > { %p1183_p6 = scmp.lt.u32.totalorder %s1174_s18, %s1371_s17 }
  0x34   : > { %p1178_p13 = pneg %p1177_p12  ;;  %p1182_p3 = por %p1181_p2, %p1180_p0 }
  0x36   : > { %p1184_p8 = por %p1183_p6, %p1182_p3 }
  0x38   : > { %p1185_p9 = pnand %p1184_p8, %p1178_p13 }
  0x3a   : > { %1188 = shalt.err (!%p1185_p9)
}
  0x3b   : > { %s1189_s24 = scalar_lea.vmem %s1373_s9, 1024  ;;  %s1247_s7 = smov [#allocation4]  }
  0x3c   : > { %p1190_p1 = scmp.ne.s32.totalorder %s1373_s9, %s1189_s24  ;;  %s1194_s13 = sshll.u32 %s1247_s7, 4  ;;  %s1195_s13 = int_to_ptr.vmem [resolvable:$false] %s1194_s13 }
  0x3d   : > { %s1196_s14 = scalar_lea.vmem %s1195_s13, 2048  ;;  %p1197_p10 = scmp.lt.s32.totalorder %s1373_s9, %s1195_s13 }
  0x3e   : > { %p1192_p4 = pnand %p1190_p1, %p1176_p11  ;;  %p1198_p12 = scmp.lt.s32.totalorder %s1196_s14, %s1189_s24 }
  0x40   : > { %p1193_p5 = pneg %p1192_p4  ;;  %p1199_p0 = por %p1198_p12, %p1197_p10 }
  0x42   : > { %p1200_p2 = pnand %p1199_p0, %p1193_p5 }
  0x44   : > { %1203 = shalt.err (!%p1200_p2)
}
  0x45   : > { %s1248_s15 = smov 512   ;;  %s1249_s16 = smov 32  }
  0x46   : > { %1009 = dma.hbm_to_vmem [thread:$0]  (!%p1375_p7), %s1371_s17, 1024, %s1373_s9, %s1379_s12, %s1248_s15, %s1248_s15, %s1249_s16  }
  0x47   : > { %p1468_p11 = scmp.ne.s32.totalorder %s1465_s30, 0 }
  0x48   : > { %s248_s8 = sand.u32 (!%p1468_p11), 1, %s1234_s26   ;;  %p1469_p13 = scmp.ne.s32.totalorder (!%p1468_p11), %s1464_s29, 0 }
  0x49   : > { %246 = sbr.rel (%p1468_p11) target bundleno = 522 (0x20a), region = 44  ;;  %s916_s18 = sshll.u32 (!%p1468_p11), %s248_s8, 6 }
  0x4a   : > { %s249_s19 = scalar_lea.sflag (!%p1468_p11), [#allocation5], %s248_s8  ;;  %s1410_s20 = scalar_lea.vmem (!%p1468_p11), [#allocation4], %s916_s18 }
  0x50   : > { %1221 = dma.done.wait (%p1469_p13), %s249_s19, 1024  }
  0x51   : > { %1223 = vsyncadd (%p1469_p13), %s249_s19, 4294966272  ;;  %p1470_p3 = scmp.ne.s32.totalorder %s1463_s5, 0 }
  0x53   : > { %1225 = dma.done.wait (%p1470_p3), [#allocation7], 8192  }
  0x54   : > { %1227 = vsyncadd (%p1470_p3), [#allocation7], 4294959104  ;;  %v1050_v0 = vld [vmem:[#allocation6 + $0x4] ss:$8 sps:$4 sm:$0xff]   ;;  %v1054_v2 = vld [vmem:[#allocation6] ss:$8 sps:$4 sm:$0xff]  }
  0x55   : > { %v1052_v1 = vld [vmem:[#allocation6 + $0x104] ss:$8 sps:$4 sm:$0xff]   ;;  %700 = vmatprep.subr.bf16.mxu1 %v1050_v0  ;;  %v1055_v3 = vld [vmem:[#allocation6 + $0x100] ss:$8 sps:$4 sm:$0xff]   ;;  %v1056_v4 = vld [vmem:[#allocation6 + $0x14] ss:$8 sps:$4 sm:$0xff]  }
  0x56   : > { %743 = vmatprep.subr.bf16.mxu0 %v1052_v1  ;;  %701 = vmatpush1.bf16.msra.mxu1 %v1054_v2  ;;  %v1058_v5 = vld [vmem:[#allocation6 + $0x114] ss:$8 sps:$4 sm:$0xff]   ;;  %v1060_v6 = vld [vmem:[#allocation6 + $0x10] ss:$8 sps:$4 sm:$0xff]   ;;  %v1062_v8 = vld [vmem:[#allocation6 + $0x24] ss:$8 sps:$4 sm:$0xff]  }
  0x57   : > { %744 = vmatpush1.bf16.msra.mxu0 %v1055_v3  ;;  %702 = vmatprep.subr.bf16.mxu1 %v1056_v4  ;;  %v1061_v7 = vld [vmem:[#allocation6 + $0x110] ss:$8 sps:$4 sm:$0xff]   ;;  %v1064_v9 = vld [vmem:[#allocation6 + $0x124] ss:$8 sps:$4 sm:$0xff]   ;;  %v1066_v10 = vld [vmem:[#allocation6 + $0x20] ss:$8 sps:$4 sm:$0xff]  }
  0x58   : > { %745 = vmatprep.subr.bf16.mxu0 %v1058_v5  ;;  %v1067_v11 = vld [vmem:[#allocation6 + $0x120] ss:$8 sps:$4 sm:$0xff]   ;;  %v1068_v12 = vld [vmem:[#allocation6 + $0x34] ss:$8 sps:$4 sm:$0xff]   ;;  %v1072_v14 = vld [vmem:[#allocation6 + $0x30] ss:$8 sps:$4 sm:$0xff]  }
  0x59   : > { %v1070_v13 = vld [vmem:[#allocation6 + $0x134] ss:$8 sps:$4 sm:$0xff]   ;;  %v1073_v15 = vld [vmem:[#allocation6 + $0x130] ss:$8 sps:$4 sm:$0xff]   ;;  %v1074_v16 = vld [vmem:[#allocation6 + $0x44] ss:$8 sps:$4 sm:$0xff]  }
  0x5a   : > { %703 = vmatpush1.bf16.msra.mxu1 %v1060_v6  ;;  %v1076_v17 = vld [vmem:[#allocation6 + $0x144] ss:$8 sps:$4 sm:$0xff]   ;;  %v1078_v18 = vld [vmem:[#allocation6 + $0x40] ss:$8 sps:$4 sm:$0xff]   ;;  %v1080_v20 = vld [vmem:[#allocation6 + $0x54] ss:$8 sps:$4 sm:$0xff]  }
  0x5b   : > { %746 = vmatpush1.bf16.msra.mxu0 %v1061_v7  ;;  %704 = vmatprep.subr.bf16.mxu1 %v1062_v8  ;;  %v1079_v19 = vld [vmem:[#allocation6 + $0x140] ss:$8 sps:$4 sm:$0xff]   ;;  %v1082_v21 = vld [vmem:[#allocation6 + $0x154] ss:$8 sps:$4 sm:$0xff]   ;;  %v1084_v22 = vld [vmem:[#allocation6 + $0x50] ss:$8 sps:$4 sm:$0xff]  }
  0x5c   : > { %747 = vmatprep.subr.bf16.mxu0 %v1064_v9  ;;  %v1085_v23 = vld [vmem:[#allocation6 + $0x150] ss:$8 sps:$4 sm:$0xff]   ;;  %v1086_v24 = vld [vmem:[#allocation6 + $0x64] ss:$8 sps:$4 sm:$0xff]   ;;  %v1090_v26 = vld [vmem:[#allocation6 + $0x60] ss:$8 sps:$4 sm:$0xff]  }
  0x5d   : > { %v1088_v25 = vld [vmem:[#allocation6 + $0x164] ss:$8 sps:$4 sm:$0xff]   ;;  %v1091_v27 = vld [vmem:[#allocation6 + $0x160] ss:$8 sps:$4 sm:$0xff]   ;;  %v1092_v28 = vld [vmem:[#allocation6 + $0x74] ss:$8 sps:$4 sm:$0xff]  }
  0x5e   : > { %705 = vmatpush1.bf16.msra.mxu1 %v1066_v10  ;;  %v1094_v29 = vld [vmem:[#allocation6 + $0x174] ss:$8 sps:$4 sm:$0xff]   ;;  %v1096_v30 = vld [vmem:[#allocation6 + $0x70] ss:$8 sps:$4 sm:$0xff]   ;;  %v1098_v32 = vld [vmem:[#allocation6 + $0x84] ss:$8 sps:$4 sm:$0xff]  }
  0x5f   : > { %748 = vmatpush1.bf16.msra.mxu0 %v1067_v11  ;;  %706 = vmatprep.subr.bf16.mxu1 %v1068_v12  ;;  %v1097_v31 = vld [vmem:[#allocation6 + $0x170] ss:$8 sps:$4 sm:$0xff]   ;;  %v1100_v33 = vld [vmem:[#allocation6 + $0x184] ss:$8 sps:$4 sm:$0xff]   ;;  %v1102_v34 = vld [vmem:[#allocation6 + $0x80] ss:$8 sps:$4 sm:$0xff]   ;;  %v370_v12 = vlaneseq }
  0x60   : > { %749 = vmatprep.subr.bf16.mxu0 %v1070_v13  ;;  %v1103_v35 = vld [vmem:[#allocation6 + $0x180] ss:$8 sps:$4 sm:$0xff]   ;;  %v1104_v36 = vld [vmem:[#allocation6 + $0x94] ss:$8 sps:$4 sm:$0xff]   ;;  %v1108_v38 = vld [vmem:[#allocation6 + $0x90] ss:$8 sps:$4 sm:$0xff]  }
  0x61   : > { %v1106_v37 = vld [vmem:[#allocation6 + $0x194] ss:$8 sps:$4 sm:$0xff]   ;;  %v1109_v39 = vld [vmem:[#allocation6 + $0x190] ss:$8 sps:$4 sm:$0xff]   ;;  %v1110_v40 = vld [vmem:[#allocation6 + $0xa4] ss:$8 sps:$4 sm:$0xff]  }
  0x62   : > { %707 = vmatpush1.bf16.msra.mxu1 %v1072_v14  ;;  %v1112_v41 = vld [vmem:[#allocation6 + $0x1a4] ss:$8 sps:$4 sm:$0xff]   ;;  %v1114_v42 = vld [vmem:[#allocation6 + $0xa0] ss:$8 sps:$4 sm:$0xff]   ;;  %v1116_v44 = vld [vmem:[#allocation6 + $0xb4] ss:$8 sps:$4 sm:$0xff]  }
  0x63   : > { %750 = vmatpush1.bf16.msra.mxu0 %v1073_v15  ;;  %708 = vmatprep.subr.bf16.mxu1 %v1074_v16  ;;  %v1115_v43 = vld [vmem:[#allocation6 + $0x1a0] ss:$8 sps:$4 sm:$0xff]   ;;  %v1118_v45 = vld [vmem:[#allocation6 + $0x1b4] ss:$8 sps:$4 sm:$0xff]   ;;  %v1120_v50 = vld [vmem:[#allocation6 + $0xb0] ss:$8 sps:$4 sm:$0xff]  }
  0x64   : > { %751 = vmatprep.subr.bf16.mxu0 %v1076_v17  ;;  %v293_v46 = vld [vmem:[%s1410_s20 + $0x8] sm:$0xff]  ;;  %v295_v48 = vld [vmem:[%s1410_s20 + $0x18] sm:$0xff]  ;;  %v292_v6 = vld [vmem:[%s1410_s20] sm:$0xff]  ;;  %v371_v13 = vshrl.u32 %v370_v12, 7  ;;  %s786_s30 = sld [smem:[#allocation2]]  ;;  %s918_s11 = sshll.u32 %s906_s3, 1 }
  0x65   : > { %v297_v47 = vld [vmem:[%s1410_s20 + $0x28] sm:$0xff]  ;;  %v299_v49 = vld [vmem:[%s1410_s20 + $0x38] sm:$0xff]  ;;  %v296_v7 = vld [vmem:[%s1410_s20 + $0x20] sm:$0xff]  ;;  %p287_p7 = scmp.lt.s32.totalorder %s918_s11, 3  ;;  %s822_s12 = sld [smem:[#allocation3]]  ;;  %vm826_vm4 = vcmask 7168  }
  0x66   : > { %709 = vmatpush1.bf16.msra.mxu1 %v1078_v18  ;;  %v1121_v51 = vld [vmem:[#allocation6 + $0x1b0] ss:$8 sps:$4 sm:$0xff]   ;;  %v301_v52 = vpack.c.bf16 %v297_v47, %v293_v46  ;;  %v303_v53 = vpack.c.bf16 %v299_v49, %v295_v48  ;;  %v1122_v54 = vld [vmem:[#allocation6 + $0xc4] ss:$8 sps:$4 sm:$0xff]   ;;  %v1126_v56 = vld [vmem:[#allocation6 + $0xc0] ss:$8 sps:$4 sm:$0xff]   ;;  %v300_v10 = vpack.c.bf16 %v296_v7, %v292_v6 }
  0x67   : > { %752 = vmatpush1.bf16.msra.mxu0 %v1079_v19  ;;  %710 = vmatprep.subr.bf16.mxu1 %v1080_v20  ;;  %v1124_v55 = vld [vmem:[#allocation6 + $0x1c4] ss:$8 sps:$4 sm:$0xff]   ;;  %v1127_v57 = vld [vmem:[#allocation6 + $0x1c0] ss:$8 sps:$4 sm:$0xff]   ;;  %v1128_v58 = vld [vmem:[#allocation6 + $0xd4] ss:$8 sps:$4 sm:$0xff]  }
  0x68   : > { %753 = vmatprep.subr.bf16.mxu0 %v1082_v21  ;;  %732 = vmatprep.mubr.bf16.mxu1 %v301_v52  ;;  %v1130_v59 = vld [vmem:[#allocation6 + $0x1d4] ss:$8 sps:$4 sm:$0xff]   ;;  %v1132_v60 = vld [vmem:[#allocation6 + $0xd0] ss:$8 sps:$4 sm:$0xff]   ;;  %v1134_v62 = vld [vmem:[#allocation6 + $0xe4] ss:$8 sps:$4 sm:$0xff]  }
  0x69   : > { %775 = vmatprep.mubr.bf16.mxu0 %v303_v53  ;;  %v1133_v61 = vld [vmem:[#allocation6 + $0x1d0] ss:$8 sps:$4 sm:$0xff]   ;;  %v1136_v63 = vld [vmem:[#allocation6 + $0x1e4] ss:$8 sps:$4 sm:$0xff]   ;;  %v1138_v0 = vld [vmem:[#allocation6 + $0xe0] ss:$8 sps:$4 sm:$0xff]  }
  0x6a   : > { %711 = vmatpush1.bf16.msra.mxu1 %v1084_v22  ;;  %v1139_v1 = vld [vmem:[#allocation6 + $0x1e0] ss:$8 sps:$4 sm:$0xff]   ;;  %v1140_v2 = vld [vmem:[#allocation6 + $0xf4] ss:$8 sps:$4 sm:$0xff]   ;;  %v1144_v4 = vld [vmem:[#allocation6 + $0xf0] ss:$8 sps:$4 sm:$0xff]  }
  0x6b   : > { %754 = vmatpush1.bf16.msra.mxu0 %v1085_v23  ;;  %712 = vmatprep.subr.bf16.mxu1 %v1086_v24  ;;  %v1142_v3 = vld [vmem:[#allocation6 + $0x1f4] ss:$8 sps:$4 sm:$0xff]   ;;  %v1145_v5 = vld [vmem:[#allocation6 + $0x1f0] ss:$8 sps:$4 sm:$0xff]   ;;  %v372_v14 = vsub.s32 0, %v371_v13  ;;  %v376_v16 = vsub.s32 1, %v371_v13  ;;  %v823_v53 = vstv %s822_s12 }
  0x6c   : > { %755 = vmatprep.subr.bf16.mxu0 %v1088_v25  ;;  %v294_v8 = vld [vmem:[%s1410_s20 + $0x10] sm:$0xff]  ;;  %v368_v15 = vld [vmem:[%s1454_s2] sm:$0x3]  ;;  %v791_v25 = vstv %s786_s30  ;;  %s1477_s11 = smov (!%p287_p7, %s918_s11), 3 }
  0x6d   : > { %v298_v9 = vld [vmem:[%s1410_s20 + $0x30] sm:$0xff]  ;;  %v373_v17 = vrot.slane %v368_v15, %v372_v14  ;;  %v377_v18 = vrot.slane %v368_v15, %v376_v16  ;;  %v800_v24 = vld [vmem:[%s1456_s4] sm:$0x3]  ;;  %s919_s21 = sshll.u32 %s1477_s11, 3 }
  0x6e   : > { %713 = vmatpush1.bf16.msra.mxu1 %v1090_v26  ;;  %v302_v11 = vpack.c.bf16 %v298_v9, %v294_v8  ;;  %s290_s24 = scalar_lea.vmem %s1458_s6, %s919_s21 }
  0x6f   : > { %756 = vmatpush1.bf16.msra.mxu0 %v1091_v27  ;;  %714 = vmatprep.subr.bf16.mxu1 %v1092_v28 }
  0x70   : > { %757 = vmatprep.subr.bf16.mxu0 %v1094_v29 }
  0x72   : > { %715 = vmatpush1.bf16.msra.mxu1 %v1096_v30 }
  0x73   : > { %758 = vmatpush1.bf16.msra.mxu0 %v1097_v31  ;;  %716 = vmatprep.subr.bf16.mxu1 %v1098_v32 }
  0x74   : > { %759 = vmatprep.subr.bf16.mxu0 %v1100_v33 }
  0x76   : > { %717 = vmatpush1.bf16.msra.mxu1 %v1102_v34 }
  0x77   : > { %760 = vmatpush1.bf16.msra.mxu0 %v1103_v35  ;;  %718 = vmatprep.subr.bf16.mxu1 %v1104_v36  ;;  %v805_v35 = vrot.slane %v800_v24, %v372_v14 }
  0x78   : > { %761 = vmatprep.subr.bf16.mxu0 %v1106_v37 }
  0x7a   : > { %719 = vmatpush1.bf16.msra.mxu1 %v1108_v38  ;;  %v809_v38 = vrot.slane %v800_v24, %v376_v16 }
  0x7b   : > { %762 = vmatpush1.bf16.msra.mxu0 %v1109_v39  ;;  %720 = vmatprep.subr.bf16.mxu1 %v1110_v40 }
  0x7c   : > { %763 = vmatprep.subr.bf16.mxu0 %v1112_v41 }
  0x7e   : > { %721 = vmatpush1.bf16.msra.mxu1 %v1114_v42 }
  0x7f   : > { %764 = vmatpush1.bf16.msra.mxu0 %v1115_v43  ;;  %722 = vmatprep.subr.bf16.mxu1 %v1116_v44 }
  0x80   : > { %765 = vmatprep.subr.bf16.mxu0 %v1118_v45 }
  0x82   : > { %723 = vmatpush1.bf16.msra.mxu1 %v1120_v50 }
  0x83   : > { %766 = vmatpush1.bf16.msra.mxu0 %v1121_v51  ;;  %724 = vmatprep.subr.bf16.mxu1 %v1122_v54 }
  0x84   : > { %767 = vmatprep.subr.bf16.mxu0 %v1124_v55 }
  0x86   : > { %725 = vmatpush1.bf16.msra.mxu1 %v1126_v56 }
  0x87   : > { %768 = vmatpush1.bf16.msra.mxu0 %v1127_v57  ;;  %726 = vmatprep.subr.bf16.mxu1 %v1128_v58 }
  0x88   : > { %769 = vmatprep.subr.bf16.mxu0 %v1130_v59 }
  0x8a   : > { %727 = vmatpush1.bf16.msra.mxu1 %v1132_v60 }
  0x8b   : > { %770 = vmatpush1.bf16.msra.mxu0 %v1133_v61  ;;  %728 = vmatprep.subr.bf16.mxu1 %v1134_v62 }
  0x8c   : > { %771 = vmatprep.subr.bf16.mxu0 %v1136_v63 }
  0x8e   : > { %729 = vmatpush1.bf16.msra.mxu1 %v1138_v0 }
  0x8f   : > { %772 = vmatpush1.bf16.msra.mxu0 %v1139_v1  ;;  %730 = vmatprep.subr.bf16.mxu1 %v1140_v2 }
  0x90   : > { %773 = vmatprep.subr.bf16.mxu0 %v1142_v3 }
  0x92   : > { %731 = vmatpush1.bf16.msra.mxu1 %v1144_v4 }
  0x93   : > { %774 = vmatpush1.bf16.msra.mxu0 %v1145_v5 }
  0x95   : > { %733 = vmatmul.mubr.bf16.vlgmr.msra.gmra.mrb[0].mxu1 %v300_v10 }
  0x96   : > { %776 = vmatmul.mubr.bf16.vlgmr.msra.gmra.mrb[0].mxu0 %v302_v11 }
 0x168   : > { %v734_v19 = vpop.f32.mrb[0].mxu1 }
 0x169   : > { %v777_v20 = vpop.f32.mrb[0].mxu0  ;;  %v735_v21 = vadd.f32 %v734_v19, %v373_v17  ;;  %v736_v22 = vpop.f32.mrb[1].mxu1 }
 0x16a   : > { %v779_v23 = vpop.f32.mrb[1].mxu0  ;;  %v737_v26 = vadd.f32 %v736_v22, %v377_v18  ;;  %v738_v27 = vpop.f32.mrb[2].mxu1 }
 0x16b   : > { %v781_v28 = vpop.f32.mrb[2].mxu0  ;;  %v778_v29 = vadd.f32 %v777_v20, %v735_v21  ;;  %v739_v30 = vadd.f32 %v738_v27, %v373_v17  ;;  %v740_v31 = vpop.f32.mrb[3].mxu1 }
 0x16c   : > { %v783_v32 = vpop.f32.mrb[3].mxu0  ;;  %v780_v33 = vadd.f32 %v779_v23, %v737_v26  ;;  %v741_v34 = vadd.f32 %v740_v31, %v377_v18 }
 0x16d   : > { %vm787_vm0 = vcmp.ge.f32.partialorder %v778_v29, 0.0  ;;  %v792_v36 = vmul.f32 %v791_v25, %v778_v29  ;;  %v782_v37 = vadd.f32 %v781_v28, %v739_v30 }
 0x16e   : > { %vm788_vm1 = vcmp.ge.f32.partialorder %v780_v33, 0.0  ;;  %v793_v39 = vmul.f32 %v791_v25, %v780_v33  ;;  %v784_v40 = vadd.f32 %v783_v32, %v741_v34 }
 0x16f   : > { %vm789_vm2 = vcmp.ge.f32.partialorder %v782_v37, 0.0  ;;  %v794_v41 = vmul.f32 %v791_v25, %v782_v37  ;;  %v796_v42 = vsel %vm787_vm0, %v778_v29, %v792_v36 }
 0x170   : > { %vm790_vm3 = vcmp.ge.f32.partialorder %v784_v40, 0.0  ;;  %v795_v43 = vmul.f32 %v791_v25, %v784_v40  ;;  %v797_v44 = vsel %vm788_vm1, %v780_v33, %v793_v39  ;;  %v812_v45 = vmul.f32 %v805_v35, %v796_v42 }
 0x171   : > { %v813_v46 = vmul.f32 %v809_v38, %v797_v44  ;;  %v798_v47 = vsel %vm789_vm2, %v782_v37, %v794_v41 }
 0x172   : > { %v799_v48 = vsel %vm790_vm3, %v784_v40, %v795_v43  ;;  %v814_v49 = vmul.f32 %v805_v35, %v798_v47 }
 0x173   : > { %v816_v50 = vadd.f32 %v813_v46, %v812_v45  ;;  %v815_v51 = vmul.f32 %v809_v38, %v799_v48 }
 0x175   : > { %817 = vadd.xlane.f32.xlu0 %v816_v50  ;;  %v819_v52 = vadd.f32 %v815_v51, %v814_v49 }
 0x179   : > { %820 = vadd.xlane.f32.xlu0 %v819_v52 }
 0x202   : > { %v818_v54 = vpop.xlane.xlu0 %817 }
 0x203   : > { %v824_v55 = vadd.f32 %v823_v53, %v818_v54 }
 0x205   : > { %827 = vst.msk [vmem:[%s290_s24] sm:$0xff] %vm826_vm4, %v824_v55 }
 0x206   : > { %v821_v56 = vpop.xlane.xlu0 %820 }
 0x207   : > { %v825_v57 = vadd.f32 %v823_v53, %v821_v56 }
 0x209   : > { %828 = vst.msk [vmem:[%s290_s24 + $0x8] sm:$0xff] %vm826_vm4, %v825_v57 }
 0x20a PF: > { %s1471_s28 = smov %s1364_s25  ;;  %p19_p6 = scmp.ge.s32.totalorder %s1338_s10, 4  }
 0x20b   : > { %s1472_s25 = smov %s1234_s26  ;;  %s1473_s26 = smov %s1238_s27 }
 0x20c   : > { %s1474_s27 = smov %s1471_s28  ;;  %s1475_s28 = smov %s1338_s10 }
 0x20d   :  { %21 = sbr.rel (!%p19_p6) target bundleno = 7 (0x7), region = 88 }
 0x214   :  { %851 = vsyncpa [#allocation5], 1 }
 0x215   :  { %853 = vsyncpa [#allocation5 + $0x1], 1 }
 0x216   :  { %854 = vsyncpa [#allocation7], 1 }

</bundles_post_ra>
